<compile_context>
chip_gen: v5e
topology: v5e:2x2
jax: 0.10.0
libtpu: 0.0.40
codegen_flags: <defaults>
</compile_context>

<pallas_src>
import jax
import jax.numpy as jnp
from jax.experimental import pallas as pl
from jax.experimental.pallas import tpu as pltpu

LANE = 128


def _round_up(n, m):
    return ((n + m - 1) // m) * m


# ----------------------------- Pallas kernel -------------------------------
def _mlp_kernel(x_ref, w0_ref, b0_ref, w1_ref, b1_ref, w2r_ref, b2_ref, o_ref):
    # x tile: (TM, IN).  Cast to bf16 for the MXU; accumulate in f32.
    xb = x_ref[...].astype(jnp.bfloat16)

    # Hidden layer 0: Linear -> ReLU  (dropout = identity at inference)
    h = jnp.dot(xb, w0_ref[...], preferred_element_type=jnp.float32)
    h = jnp.maximum(h + b0_ref[...], 0.0)          # bias/ReLU in f32 (VPU)

    # Hidden layer 1: Linear -> ReLU
    h = jnp.dot(h.astype(jnp.bfloat16), w1_ref[...],
                preferred_element_type=jnp.float32)
    h = jnp.maximum(h + b1_ref[...], 0.0)

    # Output layer: Linear(H1, 1).  Contract h's hidden dim against the
    # transposed weight row (1, H1P) so the per-row scalars land in the LANE
    # dimension -> lane-dense (1, TM) result instead of a (TM, 1) column.
    out_t = jax.lax.dot_general(
        w2r_ref[...], h.astype(jnp.bfloat16),
        dimension_numbers=(((1,), (1,)), ((), ())),
        preferred_element_type=jnp.float32)        # (1, TM)
    o_ref[0] = (out_t + b2_ref[...]).astype(o_ref.dtype)


# ------------------------------- wrapper ------------------------------------
def nnet_forward(x, packed, *, tm=1024):
    """Fused MLP forward.  x: (batch, in_features); packed from pack_params().

    Returns (batch, 1) float32.
    """
    batch, in_features = x.shape
    w0, b0 = packed["w0"], packed["b0"]
    w1, b1 = packed["w1"], packed["b1"]
    w2r, b2 = packed["w2r"], packed["b2"]
    assert w0.shape[0] == in_features

    tm = max(LANE, _round_up(tm, LANE))            # lane-dense output tile
    n_tiles = pl.cdiv(batch, tm)
    padded = n_tiles * tm
    if padded != batch:   # prefer batch % tm == 0 in production (avoids a copy)
        x = jnp.pad(x, ((0, padded - batch), (0, 0)))

    hp = w0.shape[1]
    flops = 2 * padded * (in_features * hp + hp * hp + hp)
    bytes_accessed = (
        padded * in_features * x.dtype.itemsize            # stream x
        + padded * 4                                        # lane-dense f32 out
        + sum(int(p.size) * p.dtype.itemsize
              for p in (w0, b0, w1, b1, w2r, b2)))          # resident params

    # Constant index_maps -> weights/biases stay VMEM-resident across the grid.
    const = lambda a: pl.BlockSpec(a.shape, lambda i, _a=a: (0,) * _a.ndim)

    out = pl.pallas_call(
        _mlp_kernel,
        grid=(n_tiles,),
        in_specs=[
            pl.BlockSpec((tm, in_features), lambda i: (i, 0)),  # streamed x tiles
            const(w0), const(b0), const(w1), const(b1), const(w2r), const(b2),
        ],
        out_specs=pl.BlockSpec((1, 1, tm), lambda i: (i, 0, 0)),
        out_shape=jax.ShapeDtypeStruct((n_tiles, 1, tm), jnp.float32),
        compiler_params=pltpu.CompilerParams(
            dimension_semantics=("parallel",)),     # shard tiles across v7x TCs
        cost_estimate=pl.CostEstimate(
            flops=flops, transcendentals=0, bytes_accessed=bytes_accessed),
    )(x, w0, b0, w1, b1, w2r, b2)

    # (n_tiles, 1, tm) -> (padded,) -> (batch, 1); tile i, lane j == row i*tm+j.
    return out.reshape(padded)[:batch].reshape(batch, 1)


# --------------------------- parameter handling -----------------------------
def init_params(key, input_features, hidden_sizes):
    """Deterministic PyTorch-style (Kaiming-uniform-ish) init.

    Weights are stored transposed relative to torch.nn.Linear, i.e. (in, out).
    Biases are stored as (1, out).
    """
    sizes = [input_features] + list(hidden_sizes) + [1]
    params = {}
    for i, (fan_in, fan_out) in enumerate(zip(sizes[:-1], sizes[1:])):
        key, kw, kb = jax.random.split(key, 3)
        bound = 1.0 / jnp.sqrt(jnp.float32(fan_in))
        params[f"w{i}"] = jax.random.uniform(
            kw, (fan_in, fan_out), jnp.float32, -bound, bound)
        params[f"b{i}"] = jax.random.uniform(
            kb, (1, fan_out), jnp.float32, -bound, bound)
    return params


def pack_params(params, *, lane=LANE):
    """Pad/cast logical params to the kernel layout.

    Weights are zero-padded to lane multiples and cast to bf16 (MXU operand
    dtype); biases stay f32.  The final layer weight is stored transposed as a
    (1, H1P) row so the kernel can emit a lane-dense output.
    """
    w0, b0 = params["w0"], params["b0"]          # (IN, H0), (1, H0)
    w1, b1 = params["w1"], params["b1"]          # (H0, H1), (1, H1)
    w2, b2 = params["w2"], params["b2"]          # (H1, 1),  (1, 1)
    h0p = _round_up(w0.shape[1], lane)
    h1p = _round_up(w1.shape[1], lane)
    pad2 = lambda a, r, c: jnp.pad(a, ((0, r - a.shape[0]), (0, c - a.shape[1])))
    bf = jnp.bfloat16
    return {
        "w0": pad2(w0, w0.shape[0], h0p).astype(bf),
        "b0": pad2(b0, 1, h0p).astype(jnp.float32),
        "w1": pad2(w1, h0p, h1p).astype(bf),
        "b1": pad2(b1, 1, h1p).astype(jnp.float32),
        "w2r": pad2(w2, h1p, 1).T.astype(bf),     # (1, H1P) row
        "b2": b2.astype(jnp.float32),             # (1, 1)
    }


# ------------------------------ reference ----------------------------------
def nnet_reference(x, params):
    """Pure-JAX reference with the kernel's numerics:
    bf16 matmul operands, f32 accumulation, f32 bias/ReLU."""
    bf, f32 = jnp.bfloat16, jnp.float32
    h = jnp.maximum(
        jnp.dot(x.astype(bf), params["w0"].astype(bf),
                preferred_element_type=f32) + params["b0"], 0.0)
    h = jnp.maximum(
        jnp.dot(h.astype(bf), params["w1"].astype(bf),
                preferred_element_type=f32) + params["b1"], 0.0)
    return (jnp.dot(h.astype(bf), params["w2"].astype(bf),
                    preferred_element_type=f32) + params["b2"])


if __name__ == "__main__":
    key = jax.random.PRNGKey(0)
    batch = 1000                 # not a multiple of TM -> exercises the pad path
    input_features = 32          # x_train.shape[1]
    hidden_sizes = [48, 24]      # trial-suggested n_units_l0, n_units_l1
    tm = 256                     # batch tile (multiple of 128); grid = 4 steps

    k_x, k_p = jax.random.split(key)
    x = jax.random.normal(k_x, (batch, input_features), jnp.float32)
    params = init_params(k_p, input_features, hidden_sizes)

    # Kernel is HBM-bound on x: feed it bf16 (halves the bytes per row).
    x_bf16 = x.astype(jnp.bfloat16)
    packed = pack_params(params)

    out = nnet_forward(x_bf16, packed, tm=tm)
    out = jax.block_until_ready(out)

    ref = nnet_reference(x_bf16, params)
    assert out.shape == (batch, 1), out.shape
    assert jnp.allclose(out, ref, atol=1e-3, rtol=1e-3), (
        "mismatch vs reference; max abs diff = %f"
        % float(jnp.max(jnp.abs(out - ref))))

    print("KERNEL_OK")
</pallas_src>

<mosaic_0001>
module attributes {stable_mosaic.version = 11 : i64} {
  func.func @_mlp_kernel(%arg0: i32, %arg1: memref<256x32xbf16, #tpu.memory_space<vmem>>, %arg2: memref<32x128xbf16, #tpu.memory_space<vmem>>, %arg3: memref<1x128xf32, #tpu.memory_space<vmem>>, %arg4: memref<128x128xbf16, #tpu.memory_space<vmem>>, %arg5: memref<1x128xf32, #tpu.memory_space<vmem>>, %arg6: memref<1x128xbf16, #tpu.memory_space<vmem>>, %arg7: memref<1x1xf32, #tpu.memory_space<vmem>>, %arg8: memref<1x1x256xf32, #tpu.memory_space<vmem>>) attributes {dimension_semantics = [#tpu.dimension_semantics<parallel>], iteration_bounds = array<i64: 4>, scalar_prefetch = 0 : i64, scratch_operands = 0 : i64, tpu.core_type = #tpu.core_type<tc>, window_params = [{transform_indices = @transform_0, window_bounds = array<i64: 256, 32>}, {pipeline_mode = #tpu.pipeline_mode<synchronous>, transform_indices = @transform_1, window_bounds = array<i64: 32, 128>}, {pipeline_mode = #tpu.pipeline_mode<synchronous>, transform_indices = @transform_2, window_bounds = array<i64: 1, 128>}, {pipeline_mode = #tpu.pipeline_mode<synchronous>, transform_indices = @transform_3, window_bounds = array<i64: 128, 128>}, {pipeline_mode = #tpu.pipeline_mode<synchronous>, transform_indices = @transform_4, window_bounds = array<i64: 1, 128>}, {pipeline_mode = #tpu.pipeline_mode<synchronous>, transform_indices = @transform_5, window_bounds = array<i64: 1, 128>}, {pipeline_mode = #tpu.pipeline_mode<synchronous>, transform_indices = @transform_6, window_bounds = array<i64: 1, 1>}, {transform_indices = @transform_7, window_bounds = array<i64: 1, 1, 256>}]} {
    %c0 = arith.constant 0 : index
    %c0_0 = arith.constant 0 : index
    %0 = vector.load %arg1[%c0, %c0_0] : memref<256x32xbf16, #tpu.memory_space<vmem>>, vector<256x32xbf16>
    %c0_1 = arith.constant 0 : index
    %c0_2 = arith.constant 0 : index
    %1 = vector.load %arg2[%c0_1, %c0_2] : memref<32x128xbf16, #tpu.memory_space<vmem>>, vector<32x128xbf16>
    %cst = arith.constant dense<0.000000e+00> : vector<256x128xf32>
    %2 = tpu.matmul %0, %1, %cst {dimension_numbers = #tpu.dot_dimension_numbers<[1], [0], [0], [1], [0, 0, 1, 1], [], []>} : vector<256x32xbf16>, vector<32x128xbf16>, vector<256x128xf32> -> vector<256x128xf32>
    %c0_3 = arith.constant 0 : index
    %c0_4 = arith.constant 0 : index
    %3 = vector.load %arg3[%c0_3, %c0_4] : memref<1x128xf32, #tpu.memory_space<vmem>>, vector<1x128xf32>
    %4 = vector.broadcast %3 : vector<1x128xf32> to vector<256x128xf32>
    %5 = arith.addf %2, %4 : vector<256x128xf32>
    %cst_5 = arith.constant 0.000000e+00 : f32
    %6 = vector.broadcast %cst_5 : f32 to vector<256x128xf32>
    %7 = arith.maximumf %5, %6 : vector<256x128xf32>
    %8 = arith.truncf %7 : vector<256x128xf32> to vector<256x128xbf16>
    %c0_6 = arith.constant 0 : index
    %c0_7 = arith.constant 0 : index
    %9 = vector.load %arg4[%c0_6, %c0_7] : memref<128x128xbf16, #tpu.memory_space<vmem>>, vector<128x128xbf16>
    %cst_8 = arith.constant dense<0.000000e+00> : vector<256x128xf32>
    %10 = tpu.matmul %8, %9, %cst_8 {dimension_numbers = #tpu.dot_dimension_numbers<[1], [0], [0], [1], [0, 0, 1, 1], [], []>} : vector<256x128xbf16>, vector<128x128xbf16>, vector<256x128xf32> -> vector<256x128xf32>
    %c0_9 = arith.constant 0 : index
    %c0_10 = arith.constant 0 : index
    %11 = vector.load %arg5[%c0_9, %c0_10] : memref<1x128xf32, #tpu.memory_space<vmem>>, vector<1x128xf32>
    %12 = vector.broadcast %11 : vector<1x128xf32> to vector<256x128xf32>
    %13 = arith.addf %10, %12 : vector<256x128xf32>
    %cst_11 = arith.constant 0.000000e+00 : f32
    %14 = vector.broadcast %cst_11 : f32 to vector<256x128xf32>
    %15 = arith.maximumf %13, %14 : vector<256x128xf32>
    %c0_12 = arith.constant 0 : index
    %c0_13 = arith.constant 0 : index
    %16 = vector.load %arg6[%c0_12, %c0_13] : memref<1x128xbf16, #tpu.memory_space<vmem>>, vector<1x128xbf16>
    %17 = arith.truncf %15 : vector<256x128xf32> to vector<256x128xbf16>
    %cst_14 = arith.constant dense<0.000000e+00> : vector<1x256xf32>
    %18 = tpu.matmul %16, %17, %cst_14 {dimension_numbers = #tpu.dot_dimension_numbers<[1], [1], [0], [0], [0, 0, 1, 0], [], []>} : vector<1x128xbf16>, vector<256x128xbf16>, vector<1x256xf32> -> vector<1x256xf32>
    %c0_15 = arith.constant 0 : index
    %c0_16 = arith.constant 0 : index
    %19 = vector.load %arg7[%c0_15, %c0_16] : memref<1x1xf32, #tpu.memory_space<vmem>>, vector<1x1xf32>
    %20 = vector.broadcast %19 : vector<1x1xf32> to vector<1x256xf32>
    %21 = arith.addf %18, %20 : vector<1x256xf32>
    %c0_17 = arith.constant 0 : index
    %c0_18 = arith.constant 0 : index
    %c0_19 = arith.constant 0 : index
    %22 = vector.load %arg8[%c0_17, %c0_18, %c0_19] : memref<1x1x256xf32, #tpu.memory_space<vmem>>, vector<1x1x256xf32>
    %23 = vector.shape_cast %22 : vector<1x1x256xf32> to vector<1x256xf32>
    %24 = vector.shape_cast %21 : vector<1x256xf32> to vector<1x1x256xf32>
    tpu.vector_store %arg8[%c0_17, %c0_18, %c0_19], %24 {strides = array<i32>} : memref<1x1x256xf32, #tpu.memory_space<vmem>>, vector<1x1x256xf32>,
    return
  }
  func.func @transform_0(%arg0: i32) -> (i32, i32) {
    %c0_i32 = arith.constant 0 : i32
    %c0_i32_0 = arith.constant 0 : i32
    return %arg0, %c0_i32 : i32, i32
  }
  func.func @transform_1(%arg0: i32) -> (i32, i32) {
    %c0_i32 = arith.constant 0 : i32
    %c0_i32_0 = arith.constant 0 : i32
    %c0_i32_1 = arith.constant 0 : i32
    return %c0_i32, %c0_i32_0 : i32, i32
  }
  func.func @transform_2(%arg0: i32) -> (i32, i32) {
    %c0_i32 = arith.constant 0 : i32
    %c0_i32_0 = arith.constant 0 : i32
    %c0_i32_1 = arith.constant 0 : i32
    return %c0_i32, %c0_i32_0 : i32, i32
  }
  func.func @transform_3(%arg0: i32) -> (i32, i32) {
    %c0_i32 = arith.constant 0 : i32
    %c0_i32_0 = arith.constant 0 : i32
    %c0_i32_1 = arith.constant 0 : i32
    return %c0_i32, %c0_i32_0 : i32, i32
  }
  func.func @transform_4(%arg0: i32) -> (i32, i32) {
    %c0_i32 = arith.constant 0 : i32
    %c0_i32_0 = arith.constant 0 : i32
    %c0_i32_1 = arith.constant 0 : i32
    return %c0_i32, %c0_i32_0 : i32, i32
  }
  func.func @transform_5(%arg0: i32) -> (i32, i32) {
    %c0_i32 = arith.constant 0 : i32
    %c0_i32_0 = arith.constant 0 : i32
    %c0_i32_1 = arith.constant 0 : i32
    return %c0_i32, %c0_i32_0 : i32, i32
  }
  func.func @transform_6(%arg0: i32) -> (i32, i32) {
    %c0_i32 = arith.constant 0 : i32
    %c0_i32_0 = arith.constant 0 : i32
    %c0_i32_1 = arith.constant 0 : i32
    return %c0_i32, %c0_i32_0 : i32, i32
  }
  func.func @transform_7(%arg0: i32) -> (i32, i32, i32) {
    %c0_i32 = arith.constant 0 : i32
    %c0_i32_0 = arith.constant 0 : i32
    %c0_i32_1 = arith.constant 0 : i32
    return %arg0, %c0_i32, %c0_i32_0 : i32, i32, i32
  }
}

</mosaic_0001>

<bundles_post_ra>
// kernel: tpu_custom_call.1
= control target key start
LH: loop header
LB: loop body
LE: loop exit
PB: predicated region body
PF: predicated region fallthrough
CT: control target
= control target key end

     0   :  { %s1477_s0 = inlined_call_operand.vmem [shape: bf16[1024,32], index: 0, kind: input, shape index: {}]   ;;  %s1478_s1 = inlined_call_operand.vmem [shape: bf16[32,128], index: 1, kind: input, shape index: {}]   ;;  %s1479_s2 = inlined_call_operand.vmem [shape: f32[1,128], index: 2, kind: input, shape index: {}]   ;;  %s1480_s3 = inlined_call_operand.vmem [shape: bf16[128,128], index: 3, kind: input, shape index: {}]   ;;  %s1481_s4 = inlined_call_operand.vmem [shape: f32[1,128], index: 4, kind: input, shape index: {}]   ;;  %s1482_s5 = inlined_call_operand.vmem [shape: bf16[1,128], index: 5, kind: input, shape index: {}]   ;;  %s1483_s6 = inlined_call_operand.<no memory space> [shape: f32[1,1], index: 6, kind: input, shape index: {}]   ;;  %s1484_s7 = inlined_call_operand.hbm [shape: f32[4,1,256], index: 7, kind: output, shape index: {}]  }
   0x1   :  { %v12_v0 = vstv %s1483_s6 }
   0x2   :  { %13 = vst [vmem:[#allocation2] sm:$0x1] %v12_v0 }
   0x3   :  { %14 = vsyncpa [#allocation4], 0 }
   0x4   :  { %16 = vsyncpa [#allocation4 + $0x1], 0  ;;  %s1243_s26 = smov 0   ;;  %s1245_s27 = smov 0  }
   0x5   :  { %s1247_s28 = smov 0   ;;  %s1249_s29 = smov 0  }
   0x6 LB: > { %s1264_s6 = sadd.s32 4294967295, %s1197_s29   ;;  %s925_s30 = sadd.s32 4294967294, %s1197_s29   ;;  %s1197_s29 = sphi %s1249_s29, %s1490_s29   ;;  %s1193_s28 = sphi %s1247_s28, %s1489_s28   ;;  %s1189_s27 = sphi %s1245_s27, %s1488_s27   ;;  %s1185_s26 = sphi %s1243_s26, %s1487_s26  }
   0x7   : > { %s1268_s8 = sadd.s32 1, %s1197_s29   ;;  %s181_s9 = sadd.s32 1, %s1193_s28 }
   0x8   : > { %s178_s10 = ssub.s32 %s1197_s29, %s1268_s8  ;;  %p191_p0 = scmp.ne.s32.totalorder %s1193_s28, %s1189_s27 }
   0x9   : > { %p179_p1 = scmp.eq.s32.totalorder %s178_s10, 0  ;;  %p192_p2 = scmp.eq.s32.totalorder %s1264_s6, 3 }
   0xa   : > { %p197_p3 = scmp.ne.s32.totalorder %s1189_s27, %s1185_s26  ;;  %p198_p4 = scmp.eq.s32.totalorder %s925_s30, 3 }
   0xb   : > { %s1279_s11 = scalar_select %p179_p1, %s1193_s28, %s181_s9  }
   0xc   : > { %p1281_p5 = por %p192_p2, %p191_p0  ;;  %p1285_p6 = por %p198_p4, %p197_p3 }
   0xd   : > { %p928_p7 = scmp.ge.s32.totalorder %s1197_s29, 1  ;;  %p243_p8 = scmp.lt.s32.totalorder %s1197_s29, 5 }
   0xf   : > { %p244_p9 = pnand %p928_p7, %p243_p8 }
  0x10   : > { %s930_s16 = sshll.u32 (!%p244_p9), %s1264_s6, 5  ;;  %s272_s15 = sand.u32 (!%p244_p9), 1, %s1189_s27  }
  0x11   : > { %247 = sbr.rel (%p244_p9) target bundleno = 759 (0x2f7), region = 48  ;;  %p276_p10 = scmp.lt.s32.totalorder (!%p244_p9), %s930_s16, 127 }
  0x12   : > { %s1053_s17 = sshll.u32 (!%p244_p9), %s1264_s6, 1  ;;  %s851_s6 = scalar_lea.sflag (!%p244_p9), [#allocation4], %s272_s15 }
  0x13   : > { %s861_s20 = scalar_lea.hbm (!%p244_p9), %s1484_s7, %s1053_s17  ;;  %s1155_s10 = scalar_lea.hbm (!%p244_p9), %s1484_s7, 8 }
  0x14   : > { %s865_s24 = sshll.u32 (!%p244_p9), %s861_s20, 4  ;;  %s866_s24 = int_to_ptr.hbm [resolvable:$true] %s865_s24 }
  0x15   : > { %s1149_s25 = sshra.s32 (!%p244_p9), %s866_s24, 4  ;;  %s1150_s25 = int_to_ptr.hbm [resolvable:$true] %s1149_s25 }
  0x16   : > { %v1073_v1 = vld [vmem:[%s1478_s1 + $0x8] sm:$0xff]  ;;  %v1072_v2 = vld [vmem:[%s1478_s1] sm:$0xff]  ;;  %s1492_s16 = smov (!%p276_p10, %s930_s16), 127  ;;  %vm414_vm0 = vcmask 261120   ;;  %v1081_v8 = vld [vmem:[%s1480_s3 + $0x38] sm:$0xff]  ;;  %vm842_vm1 = vcmask 1040384   ;;  %p1156_p0 = scmp.lt.s32.totalorder %s1150_s25, %s1484_s7 }
  0x17   : > { %469 = vmatpush.bf16.msra.mxu0 %v1073_v1  ;;  %1082 = vmatpush.bf16.msra.mxu3 %v1073_v1  ;;  %s931_s19 = sshll.u32 %s1492_s16, 2  ;;  %v1080_v10 = vld [vmem:[%s1480_s3 + $0x30] sm:$0xff]  ;;  %v1079_v11 = vld [vmem:[%s1480_s3 + $0x28] sm:$0xff]  ;;  %v1078_v12 = vld [vmem:[%s1480_s3 + $0x20] sm:$0xff]  ;;  %s929_s16 = sshll.u32 %s272_s15, 1 }
  0x18   : > { %s1301_s22 = scalar_lea.vmem %s1477_s0, %s931_s19  ;;  %668 = vmatpush.bf16.msra.mxu1 %v1081_v8  ;;  %1084 = vmatpush.bf16.msra.mxu2 %v1081_v8  ;;  %v1077_v13 = vld [vmem:[%s1480_s3 + $0x18] sm:$0xff]  ;;  %v1076_v15 = vld [vmem:[%s1480_s3 + $0x10] sm:$0xff]  ;;  %v1075_v16 = vld [vmem:[%s1480_s3 + $0x8] sm:$0xff]  ;;  %s274_s21 = scalar_lea.vmem [#allocation3], %s929_s16 }
  0x19   : > { %v1056_v3 = vld [vmem:[%s1301_s22] sm:$0xff]  ;;  %v1057_v4 = vld [vmem:[%s1301_s22 + $0x8] sm:$0xff]  ;;  %v1058_v5 = vld [vmem:[%s1301_s22 + $0x10] sm:$0xff]  ;;  %s863_s23 = sshll.u32 %s274_s21, 4  ;;  %s1151_s30 = scalar_lea.hbm %s1150_s25, 2  ;;  %s864_s23 = int_to_ptr.vmem [resolvable:$true] %s863_s23 }
  0x1a   : > { %v1059_v6 = vld [vmem:[%s1301_s22 + $0x18] sm:$0xff]  ;;  %v1060_v7 = vld [vmem:[%s1301_s22 + $0x20] sm:$0xff]  ;;  %v1061_v9 = vld [vmem:[%s1301_s22 + $0x28] sm:$0xff]  ;;  %p1152_p11 = scmp.ne.s32.totalorder %s1150_s25, %s1151_s30  ;;  %p1157_p1 = scmp.lt.s32.totalorder %s1155_s10, %s1151_s30 }
  0x1b   : > { %470 = vmatpush.bf16.msra.mxu0 %v1072_v2  ;;  %1083 = vmatpush.bf16.msra.mxu3 %v1072_v2  ;;  %v1062_v14 = vld [vmem:[%s1301_s22 + $0x30] sm:$0xff]  ;;  %v1074_v17 = vld [vmem:[%s1480_s3] sm:$0xff]  ;;  %v1063_v18 = vld [vmem:[%s1301_s22 + $0x38] sm:$0xff] }
  0x1c   : > { %669 = vmatpush.bf16.msra.mxu1 %v1080_v10  ;;  %1085 = vmatpush.bf16.msra.mxu2 %v1080_v10  ;;  %v1066_v19 = vld [vmem:[%s1301_s22 + $0x50] sm:$0xff]  ;;  %v1064_v20 = vld [vmem:[%s1301_s22 + $0x40] sm:$0xff]  ;;  %v1067_v23 = vld [vmem:[%s1301_s22 + $0x58] sm:$0xff]  ;;  %p1153_p12 = pnand %p1152_p11, %p1281_p5  ;;  %p1158_p2 = por %p1157_p1, %p1156_p0 }
  0x1d   : > { %v1349_v22 = vld [vmem:[%s1479_s2] ss:$0 sm:$0xff]  ;;  %v1065_v30 = vld [vmem:[%s1301_s22 + $0x48] sm:$0xff]  ;;  %v1070_v48 = vld [vmem:[%s1301_s22 + $0x70] sm:$0xff] }
  0x1e   : > { %1004 = vmatmul.msk.bf16.vlgmr.msra.gmra.mxu0 %vm414_vm0, %v1056_v3  ;;  %1014 = vmatmul.msk.bf16.vlgmr.msra.gmra.mxu3 %vm414_vm0, %v1066_v19  ;;  %v1068_v32 = vld [vmem:[%s1301_s22 + $0x60] sm:$0xff]  ;;  %v1069_v40 = vld [vmem:[%s1301_s22 + $0x68] sm:$0xff]  ;;  %v1071_v56 = vld [vmem:[%s1301_s22 + $0x78] sm:$0xff]  ;;  %p1154_p13 = pneg %p1153_p12 }
  0x20   : > { %670 = vmatpush.bf16.msra.mxu1 %v1079_v11  ;;  %1086 = vmatpush.bf16.msra.mxu2 %v1079_v11  ;;  %p1159_p3 = pnand %p1158_p2, %p1154_p13 }
  0x24   : > { %671 = vmatpush.bf16.msra.mxu1 %v1078_v12  ;;  %1087 = vmatpush.bf16.msra.mxu2 %v1078_v12 }
  0x28   : > { %672 = vmatpush.bf16.msra.mxu1 %v1077_v13  ;;  %1088 = vmatpush.bf16.msra.mxu2 %v1077_v13 }
  0x2c   : > { %673 = vmatpush.bf16.msra.mxu1 %v1076_v15  ;;  %1089 = vmatpush.bf16.msra.mxu2 %v1076_v15 }
  0x2e   : > { %1005 = vmatmul.msk.bf16.gmra.mxu0 %vm414_vm0, %v1057_v4  ;;  %1015 = vmatmul.msk.bf16.gmra.mxu3 %vm414_vm0, %v1067_v23 }
  0x30   : > { %674 = vmatpush.bf16.msra.mxu1 %v1075_v16  ;;  %1090 = vmatpush.bf16.msra.mxu2 %v1075_v16 }
  0x34   : > { %675 = vmatpush.bf16.msra.mxu1 %v1074_v17  ;;  %1091 = vmatpush.bf16.msra.mxu2 %v1074_v17 }
  0x3e   : > { %1006 = vmatmul.msk.bf16.gmra.mxu0 %vm414_vm0, %v1058_v5  ;;  %1016 = vmatmul.msk.bf16.gmra.mxu3 %vm414_vm0, %v1068_v32 }
  0x4e   : > { %1007 = vmatmul.msk.bf16.gmra.mxu0 %vm414_vm0, %v1059_v6  ;;  %1017 = vmatmul.msk.bf16.gmra.mxu3 %vm414_vm0, %v1069_v40 }
  0x5e   : > { %1008 = vmatmul.msk.bf16.gmra.mxu0 %vm414_vm0, %v1060_v7  ;;  %1018 = vmatmul.msk.bf16.gmra.mxu3 %vm414_vm0, %v1070_v48 }
  0x6e   : > { %1009 = vmatmul.msk.bf16.gmra.mxu0 %vm414_vm0, %v1061_v9  ;;  %1019 = vmatmul.msk.bf16.gmra.mxu3 %vm414_vm0, %v1071_v56 }
  0x7e   : > { %1010 = vmatmul.msk.bf16.gmra.mxu0 %vm414_vm0, %v1062_v14 }
  0x8e   : > { %1011 = vmatmul.msk.bf16.gmra.mxu0 %vm414_vm0, %v1063_v18 }
  0x9b   : > { %v472_v21 = vpop.f32.mrf.mxu0 }
  0x9c   : > { %v473_v24 = vadd.f32 %v1349_v22, %v472_v21 }
  0x9e   : > { %1012 = vmatmul.msk.bf16.gmra.mxu0 %vm414_vm0, %v1064_v20  ;;  %v552_v27 = vmax.f32 %v473_v24, 0.0 }
  0xa1   : > { %v522_v21 = vpop.f32.mrf.mxu3 }
  0xa3   : > { %v474_v25 = vpop.f32.mrf.mxu0 }
  0xa4   : > { %v475_v26 = vadd.f32 %v1349_v22, %v474_v25 }
  0xa6   : > { %v553_v28 = vmax.f32 %v475_v26, 0.0 }
  0xa8   : > { %v584_v29 = vpack.c.bf16 %v553_v28, %v552_v27 }
  0xaa   : > { %676 = vmatmul.bf16.vlgmr.msra.gmra.mxu1 %v584_v29 }
  0xab   : > { %v477_v31 = vpop.f32.mrf.mxu0 }
  0xac   : > { %v478_v33 = vadd.f32 %v1349_v22, %v477_v31  ;;  %v1385_v31 = vld [vmem:[%s1481_s4] ss:$0 sm:$0xff] }
  0xae   : > { %1013 = vmatmul.msk.bf16.gmra.mxu0 %vm414_vm0, %v1065_v30  ;;  %v554_v36 = vmax.f32 %v478_v33, 0.0  ;;  %v524_v30 = vpop.f32.mrf.mxu3 }
  0xb3   : > { %v479_v34 = vpop.f32.mrf.mxu0 }
  0xb4   : > { %v480_v35 = vadd.f32 %v1349_v22, %v479_v34 }
  0xb6   : > { %v555_v37 = vmax.f32 %v480_v35, 0.0  ;;  %v527_v40 = vpop.f32.mrf.mxu3 }
  0xb8   : > { %v585_v38 = vpack.c.bf16 %v555_v37, %v554_v36 }
  0xba   : > { %681 = vmatmul.bf16.gmra.mxu1 %v585_v38 }
  0xbb   : > { %v482_v39 = vpop.f32.mrf.mxu0 }
  0xbc   : > { %v483_v41 = vadd.f32 %v1349_v22, %v482_v39 }
  0xbe   : > { %v556_v44 = vmax.f32 %v483_v41, 0.0 }
  0xc3   : > { %v484_v42 = vpop.f32.mrf.mxu0 }
  0xc4   : > { %v485_v43 = vadd.f32 %v1349_v22, %v484_v42 }
  0xc6   : > { %v557_v45 = vmax.f32 %v485_v43, 0.0 }
  0xc8   : > { %v586_v46 = vpack.c.bf16 %v557_v45, %v556_v44 }
  0xca   : > { %686 = vmatmul.bf16.gmra.mxu1 %v586_v46 }
  0xcb   : > { %v487_v47 = vpop.f32.mrf.mxu0 }
  0xcc   : > { %v488_v49 = vadd.f32 %v1349_v22, %v487_v47  ;;  %v529_v47 = vpop.f32.mrf.mxu3 }
  0xce   : > { %v558_v52 = vmax.f32 %v488_v49, 0.0 }
  0xd3   : > { %v489_v50 = vpop.f32.mrf.mxu0 }
  0xd4   : > { %v490_v51 = vadd.f32 %v1349_v22, %v489_v50  ;;  %v523_v50 = vadd.f32 %v1349_v22, %v522_v21 }
  0xd6   : > { %v559_v53 = vmax.f32 %v490_v51, 0.0  ;;  %v525_v51 = vadd.f32 %v1349_v22, %v524_v30 }
  0xd8   : > { %v587_v54 = vpack.c.bf16 %v559_v53, %v558_v52  ;;  %v573_v56 = vmax.f32 %v525_v51, 0.0 }
  0xda   : > { %691 = vmatmul.bf16.gmra.mxu1 %v587_v54 }
  0xdb   : > { %v492_v55 = vpop.f32.mrf.mxu0 }
  0xdc   : > { %v493_v57 = vadd.f32 %v1349_v22, %v492_v55  ;;  %v572_v55 = vmax.f32 %v523_v50, 0.0 }
  0xde   : > { %v560_v60 = vmax.f32 %v493_v57, 0.0 }
  0xe3   : > { %v494_v58 = vpop.f32.mrf.mxu0 }
  0xe4   : > { %v495_v59 = vadd.f32 %v1349_v22, %v494_v58 }
  0xe6   : > { %v561_v61 = vmax.f32 %v495_v59, 0.0  ;;  %v532_v59 = vpop.f32.mrf.mxu3 }
  0xe8   : > { %v588_v62 = vpack.c.bf16 %v561_v61, %v560_v60  ;;  %v594_v60 = vpack.c.bf16 %v573_v56, %v572_v55 }
  0xea   : > { %696 = vmatmul.bf16.gmra.mxu1 %v588_v62 }
  0xeb   : > { %v497_v63 = vpop.f32.mrf.mxu0 }
  0xec   : > { %v498_v0 = vadd.f32 %v1349_v22, %v497_v63  ;;  %v528_v63 = vadd.f32 %v1349_v22, %v527_v40 }
  0xee   : > { %v562_v3 = vmax.f32 %v498_v0, 0.0  ;;  %v530_v0 = vadd.f32 %v1349_v22, %v529_v47 }
  0xf3   : > { %v499_v1 = vpop.f32.mrf.mxu0 }
  0xf4   : > { %v500_v2 = vadd.f32 %v1349_v22, %v499_v1 }
  0xf6   : > { %v563_v4 = vmax.f32 %v500_v2, 0.0  ;;  %v534_v2 = vpop.f32.mrf.mxu3 }
  0xf8   : > { %v589_v5 = vpack.c.bf16 %v563_v4, %v562_v3 }
  0xfa   : > { %701 = vmatmul.bf16.gmra.mxu1 %v589_v5  ;;  %v574_v5 = vmax.f32 %v528_v63, 0.0 }
  0xfb   : > { %v502_v6 = vpop.f32.mrf.mxu0 }
  0xfc   : > { %v503_v7 = vadd.f32 %v1349_v22, %v502_v6  ;;  %v575_v6 = vmax.f32 %v530_v0, 0.0 }
  0xfe   : > { %v564_v10 = vmax.f32 %v503_v7, 0.0 }
 0x103   : > { %v504_v8 = vpop.f32.mrf.mxu0 }
 0x104   : > { %v505_v9 = vadd.f32 %v1349_v22, %v504_v8 }
 0x106   : > { %v565_v11 = vmax.f32 %v505_v9, 0.0  ;;  %v595_v9 = vpack.c.bf16 %v575_v6, %v574_v5 }
 0x108   : > { %v590_v12 = vpack.c.bf16 %v565_v11, %v564_v10  ;;  %v537_v10 = vpop.f32.mrf.mxu3 }
 0x10a   : > { %706 = vmatmul.bf16.gmra.mxu1 %v590_v12 }
 0x10b   : > { %v507_v13 = vpop.f32.mrf.mxu0 }
 0x10c   : > { %v508_v14 = vadd.f32 %v1349_v22, %v507_v13  ;;  %v533_v13 = vadd.f32 %v1349_v22, %v532_v59 }
 0x10e   : > { %v566_v17 = vmax.f32 %v508_v14, 0.0  ;;  %v535_v14 = vadd.f32 %v1349_v22, %v534_v2 }
 0x110   : > { %v539_v21 = vpop.f32.mrf.mxu3 }
 0x113   : > { %v509_v15 = vpop.f32.mrf.mxu0 }
 0x114   : > { %v510_v16 = vadd.f32 %v1349_v22, %v509_v15 }
 0x116   : > { %v567_v18 = vmax.f32 %v510_v16, 0.0 }
 0x118   : > { %v591_v19 = vpack.c.bf16 %v567_v18, %v566_v17  ;;  %v576_v18 = vmax.f32 %v533_v13, 0.0 }
 0x11a   : > { %711 = vmatmul.bf16.gmra.mxu1 %v591_v19  ;;  %v577_v19 = vmax.f32 %v535_v14, 0.0 }
 0x11b   : > { %v512_v20 = vpop.f32.mrf.mxu0 }
 0x11c   : > { %v513_v23 = vadd.f32 %v1349_v22, %v512_v20 }
 0x11e   : > { %v568_v26 = vmax.f32 %v513_v23, 0.0 }
 0x123   : > { %v514_v24 = vpop.f32.mrf.mxu0 }
 0x124   : > { %v515_v25 = vadd.f32 %v1349_v22, %v514_v24  ;;  %v596_v24 = vpack.c.bf16 %v577_v19, %v576_v18 }
 0x126   : > { %v569_v27 = vmax.f32 %v515_v25, 0.0 }
 0x127   : > { %v677_v28 = vpop.f32.mrf.mxu1 }
 0x128   : > { %v592_v29 = vpack.c.bf16 %v569_v27, %v568_v26  ;;  %v678_v33 = vadd.f32 %v1385_v31, %v677_v28  ;;  %v542_v27 = vpop.f32.mrf.mxu3  ;;  %v538_v28 = vadd.f32 %v1349_v22, %v537_v10 }
 0x12a   : > { %716 = vmatmul.bf16.gmra.mxu1 %v592_v29  ;;  %v757_v36 = vmax.f32 %v678_v33, 0.0  ;;  %v540_v29 = vadd.f32 %v1349_v22, %v539_v21 }
 0x12b   : > { %v517_v32 = vpop.f32.mrf.mxu0 }
 0x12c   : > { %v518_v37 = vadd.f32 %v1349_v22, %v517_v32 }
 0x12e   : > { %v570_v43 = vmax.f32 %v518_v37, 0.0 }
 0x12f   : > { %v679_v34 = vpop.f32.mrf.mxu1 }
 0x130   : > { %v680_v35 = vadd.f32 %v1385_v31, %v679_v34  ;;  %v578_v34 = vmax.f32 %v538_v28, 0.0 }
 0x132   : > { %v758_v38 = vmax.f32 %v680_v35, 0.0  ;;  %v579_v35 = vmax.f32 %v540_v29, 0.0 }
 0x133   : > { %v519_v39 = vpop.f32.mrf.mxu0 }
 0x134   : > { %v520_v41 = vadd.f32 %v1349_v22, %v519_v39  ;;  %v1391_v42 = vpack.c.bf16 %v758_v38, %v757_v36  ;;  %v597_v38 = vpack.c.bf16 %v579_v35, %v578_v34  ;;  %v544_v39 = vpop.f32.mrf.mxu3 }
 0x136   : > { %v571_v44 = vmax.f32 %v520_v41, 0.0  ;;  %v543_v41 = vadd.f32 %v1349_v22, %v542_v27 }
 0x137   : > { %v682_v45 = vpop.f32.mrf.mxu1 }
 0x138   : > { %v593_v46 = vpack.c.bf16 %v571_v44, %v570_v43  ;;  %v683_v48 = vadd.f32 %v1385_v31, %v682_v45  ;;  %v545_v43 = vadd.f32 %v1349_v22, %v544_v39  ;;  %v580_v45 = vmax.f32 %v543_v41, 0.0 }
 0x13a   : > { %721 = vmatmul.bf16.vlgmr.msra.gmra.mxu2 %v593_v46  ;;  %v759_v53 = vmax.f32 %v683_v48, 0.0  ;;  %v581_v46 = vmax.f32 %v545_v43, 0.0 }
 0x13c   : > { %v547_v44 = vpop.f32.mrf.mxu3  ;;  %v598_v48 = vpack.c.bf16 %v581_v46, %v580_v45 }
 0x13d   : > { %v548_v51 = vadd.f32 %v1349_v22, %v547_v44 }
 0x13f   : > { %v684_v49 = vpop.f32.mrf.mxu1 }
 0x140   : > { %v685_v52 = vadd.f32 %v1385_v31, %v684_v49 }
 0x142   : > { %v760_v54 = vmax.f32 %v685_v52, 0.0 }
 0x144   : > { %v1397_v57 = vpack.c.bf16 %v760_v54, %v759_v53  ;;  %v549_v49 = vpop.f32.mrf.mxu3  ;;  %v582_v53 = vmax.f32 %v548_v51, 0.0 }
 0x145   : > { %v550_v52 = vadd.f32 %v1349_v22, %v549_v49 }
 0x147   : > { %v687_v58 = vpop.f32.mrf.mxu1  ;;  %v583_v54 = vmax.f32 %v550_v52, 0.0 }
 0x148   : > { %v688_v61 = vadd.f32 %v1385_v31, %v687_v58 }
 0x149   : > { %v599_v56 = vpack.c.bf16 %v583_v54, %v582_v53 }
 0x14a   : > { %726 = vmatmul.bf16.gmra.mxu2 %v594_v60  ;;  %v761_v3 = vmax.f32 %v688_v61, 0.0 }
 0x14f   : > { %v689_v62 = vpop.f32.mrf.mxu1 }
 0x150   : > { %v690_v1 = vadd.f32 %v1385_v31, %v689_v62 }
 0x152   : > { %v762_v4 = vmax.f32 %v690_v1, 0.0 }
 0x154   : > { %v1403_v7 = vpack.c.bf16 %v762_v4, %v761_v3 }
 0x157   : > { %v692_v8 = vpop.f32.mrf.mxu1 }
 0x158   : > { %v693_v11 = vadd.f32 %v1385_v31, %v692_v8 }
 0x15a   : > { %731 = vmatmul.bf16.gmra.mxu2 %v595_v9  ;;  %v763_v16 = vmax.f32 %v693_v11, 0.0 }
 0x15f   : > { %v694_v12 = vpop.f32.mrf.mxu1 }
 0x160   : > { %v695_v15 = vadd.f32 %v1385_v31, %v694_v12 }
 0x162   : > { %v764_v17 = vmax.f32 %v695_v15, 0.0 }
 0x164   : > { %v793_v20 = vpack.c.bf16 %v764_v17, %v763_v16 }
 0x167   : > { %v697_v23 = vpop.f32.mrf.mxu1 }
 0x168   : > { %v698_v25 = vadd.f32 %v1385_v31, %v697_v23 }
 0x16a   : > { %736 = vmatmul.bf16.gmra.mxu2 %v596_v24  ;;  %v765_v32 = vmax.f32 %v698_v25, 0.0 }
 0x16f   : > { %v699_v26 = vpop.f32.mrf.mxu1 }
 0x170   : > { %v700_v30 = vadd.f32 %v1385_v31, %v699_v26 }
 0x172   : > { %v766_v33 = vmax.f32 %v700_v30, 0.0 }
 0x174   : > { %v794_v36 = vpack.c.bf16 %v766_v33, %v765_v32 }
 0x177   : > { %v702_v37 = vpop.f32.mrf.mxu1 }
 0x178   : > { %v703_v5 = vadd.f32 %v1385_v31, %v702_v37 }
 0x17a   : > { %741 = vmatmul.bf16.gmra.mxu2 %v597_v38  ;;  %v767_v8 = vmax.f32 %v703_v5, 0.0 }
 0x17f   : > { %v704_v40 = vpop.f32.mrf.mxu1 }
 0x180   : > { %v705_v3 = vadd.f32 %v1385_v31, %v704_v40 }
 0x182   : > { %v768_v6 = vmax.f32 %v705_v3, 0.0 }
 0x184   : > { %v795_v9 = vpack.c.bf16 %v768_v6, %v767_v8 }
 0x187   : > { %v707_v47 = vpop.f32.mrf.mxu1 }
 0x188   : > { %v708_v1 = vadd.f32 %v1385_v31, %v707_v47 }
 0x18a   : > { %746 = vmatmul.bf16.gmra.mxu2 %v598_v48  ;;  %v769_v22 = vmax.f32 %v708_v1, 0.0 }
 0x18f   : > { %v709_v50 = vpop.f32.mrf.mxu1 }
 0x190   : > { %v710_v63 = vadd.f32 %v1385_v31, %v709_v50 }
 0x192   : > { %v770_v2 = vmax.f32 %v710_v63, 0.0 }
 0x194   : > { %v796_v4 = vpack.c.bf16 %v770_v2, %v769_v22 }
 0x197   : > { %v712_v55 = vpop.f32.mrf.mxu1 }
 0x198   : > { %v713_v58 = vadd.f32 %v1385_v31, %v712_v55 }
 0x19a   : > { %751 = vmatmul.bf16.gmra.mxu2 %v599_v56  ;;  %v771_v61 = vmax.f32 %v713_v58, 0.0 }
 0x19f   : > { %v714_v59 = vpop.f32.mrf.mxu1 }
 0x1a0   : > { %v715_v60 = vadd.f32 %v1385_v31, %v714_v59 }
 0x1a2   : > { %v772_v62 = vmax.f32 %v715_v60, 0.0  ;;  %v789_v60 = vld [vmem:[%s1482_s5] sm:$0x1] }
 0x1a4   : > { %v797_v0 = vpack.c.bf16 %v772_v62, %v771_v61  ;;  %v806_v61 = vld [vmem:[#allocation2] sm:$0x1]  ;;  %v1199_v62 = vmov 0  }
 0x1a5   : > { %1132 = vset.pattern.permute.xlu0 %v1199_v62 }
 0x1a6   : > { %813 = vmatpush.bf16.xpose.msrb.mxu2 %v797_v0  ;;  %809 = vperm.xlu0 %1132, %v806_v61  }
 0x1a7   : > { %v717_v63 = vpop.f32.mrf.mxu1 }
 0x1a8   : > { %v718_v2 = vadd.f32 %v1385_v31, %v717_v63 }
 0x1aa   : > { %v773_v3 = vmax.f32 %v718_v2, 0.0 }
 0x1ae   : > { %814 = vmatpush.bf16.xpose.msrb.mxu2 %v796_v4 }
 0x1af   : > { %v719_v0 = vpop.f32.mrf.mxu1 }
 0x1b0   : > { %v720_v1 = vadd.f32 %v1385_v31, %v719_v0 }
 0x1b2   : > { %v774_v22 = vmax.f32 %v720_v1, 0.0 }
 0x1b4   : > { %v798_v4 = vpack.c.bf16 %v774_v22, %v773_v3 }
 0x1b6   : > { %815 = vmatpush.bf16.xpose.msrb.mxu2 %v795_v9 }
 0x1bd   : > { %v722_v10 = vpop.f32.mrf.mxu2 }
 0x1be   : > { %816 = vmatpush.bf16.xpose.msrb.mxu2 %v794_v36  ;;  %v723_v11 = vadd.f32 %v1385_v31, %v722_v10  ;;  %v845_v10 = vlaneseq }
 0x1c0   : > { %v775_v14 = vmax.f32 %v723_v11, 0.0  ;;  %vm847_vm2 = vcmp.lt.s32.totalorder %v845_v10, 256 }
 0x1c5   : > { %v724_v12 = vpop.f32.mrf.mxu2 }
 0x1c6   : > { %v725_v13 = vadd.f32 %v1385_v31, %v724_v12  ;;  %817 = vmatpush.bf16.xpose.msrb.mxu2 %v793_v20 }
 0x1c8   : > { %v776_v15 = vmax.f32 %v725_v13, 0.0 }
 0x1ca   : > { %v799_v16 = vpack.c.bf16 %v776_v15, %v775_v14 }
 0x1cd   : > { %v727_v17 = vpop.f32.mrf.mxu2 }
 0x1ce   : > { %818 = vmatpush.bf16.xpose.msrb.mxu2 %v1403_v7  ;;  %v728_v18 = vadd.f32 %v1385_v31, %v727_v17 }
 0x1d0   : > { %v777_v23 = vmax.f32 %v728_v18, 0.0 }
 0x1d5   : > { %v729_v19 = vpop.f32.mrf.mxu2 }
 0x1d6   : > { %v730_v21 = vadd.f32 %v1385_v31, %v729_v19  ;;  %819 = vmatpush.bf16.xpose.msrb.mxu2 %v1397_v57 }
 0x1d8   : > { %v778_v24 = vmax.f32 %v730_v21, 0.0 }
 0x1da   : > { %v800_v25 = vpack.c.bf16 %v778_v24, %v777_v23 }
 0x1dd   : > { %v732_v26 = vpop.f32.mrf.mxu2 }
 0x1de   : > { %820 = vmatpush.bf16.xpose.msrb.mxu2 %v1391_v42  ;;  %v733_v20 = vadd.f32 %v1385_v31, %v732_v26 }
 0x1e0   : > { %v779_v29 = vmax.f32 %v733_v20, 0.0 }
 0x1e5   : > { %v734_v27 = vpop.f32.mrf.mxu2  ;;  %821 = vmatmul.bf16.vlgmr.msrb.gmra.mxu2 %v789_v60 }
 0x1e6   : > { %v735_v28 = vadd.f32 %v1385_v31, %v734_v27 }
 0x1e8   : > { %v780_v7 = vmax.f32 %v735_v28, 0.0 }
 0x1ea   : > { %v801_v30 = vpack.c.bf16 %v780_v7, %v779_v29 }
 0x1ed   : > { %v737_v32 = vpop.f32.mrf.mxu2 }
 0x1ee   : > { %v738_v33 = vadd.f32 %v1385_v31, %v737_v32 }
 0x1f0   : > { %v781_v35 = vmax.f32 %v738_v33, 0.0 }
 0x1f5   : > { %v739_v34 = vpop.f32.mrf.mxu2 }
 0x1f6   : > { %v740_v57 = vadd.f32 %v1385_v31, %v739_v34 }
 0x1f8   : > { %v782_v36 = vmax.f32 %v740_v57, 0.0 }
 0x1fa   : > { %v802_v37 = vpack.c.bf16 %v782_v36, %v781_v35 }
 0x1fd   : > { %v742_v38 = vpop.f32.mrf.mxu2 }
 0x1fe   : > { %v743_v55 = vadd.f32 %v1385_v31, %v742_v38 }
 0x200   : > { %v783_v58 = vmax.f32 %v743_v55, 0.0 }
 0x205   : > { %v744_v39 = vpop.f32.mrf.mxu2 }
 0x206   : > { %v745_v53 = vadd.f32 %v1385_v31, %v744_v39 }
 0x208   : > { %v784_v56 = vmax.f32 %v745_v53, 0.0 }
 0x20a   : > { %v803_v59 = vpack.c.bf16 %v784_v56, %v783_v58 }
 0x20d   : > { %v747_v42 = vpop.f32.mrf.mxu2 }
 0x20e   : > { %v748_v50 = vadd.f32 %v1385_v31, %v747_v42 }
 0x210   : > { %v785_v52 = vmax.f32 %v748_v50, 0.0 }
 0x215   : > { %v749_v40 = vpop.f32.mrf.mxu2 }
 0x216   : > { %v750_v48 = vadd.f32 %v1385_v31, %v749_v40 }
 0x218   : > { %v786_v51 = vmax.f32 %v750_v48, 0.0  ;;  %v810_v8 = vpop.permute.xlu0 %809 }
 0x219   : > { %v812_v9 = vperm.slane %v810_v8, 0 }
 0x21a   : > { %v804_v54 = vpack.c.bf16 %v786_v51, %v785_v52 }
 0x21d   : > { %v752_v41 = vpop.f32.mrf.mxu2 }
 0x21e   : > { %v753_v43 = vadd.f32 %v1385_v31, %v752_v41 }
 0x220   : > { %v787_v46 = vmax.f32 %v753_v43, 0.0 }
 0x225   : > { %v754_v44 = vpop.f32.mrf.mxu2 }
 0x226   : > { %v755_v45 = vadd.f32 %v1385_v31, %v754_v44 }
 0x228   : > { %v788_v47 = vmax.f32 %v755_v45, 0.0 }
 0x22a   : > { %v805_v49 = vpack.c.bf16 %v788_v47, %v787_v46 }
 0x22c   : > { %826 = vmatpush.bf16.xpose.msrb.mxu3 %v805_v49 }
 0x234   : > { %827 = vmatpush.bf16.xpose.msrb.mxu3 %v804_v54 }
 0x23c   : > { %828 = vmatpush.bf16.xpose.msrb.mxu3 %v803_v59 }
 0x244   : > { %829 = vmatpush.bf16.xpose.msrb.mxu3 %v802_v37 }
 0x24c   : > { %830 = vmatpush.bf16.xpose.msrb.mxu3 %v801_v30 }
 0x254   : > { %831 = vmatpush.bf16.xpose.msrb.mxu3 %v800_v25 }
 0x25c   : > { %832 = vmatpush.bf16.xpose.msrb.mxu3 %v799_v16 }
 0x264   : > { %833 = vmatpush.bf16.xpose.msrb.mxu3 %v798_v4 }
 0x268   : > { %v822_v5 = vpop.f32.mrf.mxu2 }
 0x269   : > { %v823_v12 = vadd.f32 %v822_v5, %v812_v9 }
 0x26b   : > { %834 = vmatmul.bf16.vlgmr.msrb.gmra.mxu3 %v789_v60 }
 0x270   : > { %v824_v6 = vpop.f32.mrf.mxu2 }
 0x2ee   : > { %v835_v11 = vpop.f32.mrf.mxu3 }
 0x2ef   : > { %v836_v31 = vadd.f32 %v835_v11, %v812_v9 }
 0x2f1   : > { %v841_v13 = vrot.slane %v836_v31, 7 }
 0x2f3   : > { %v843_v14 = vsel %vm842_vm1, %v823_v12, %v841_v13 }
 0x2f4   : > { %849 = vst.msk [vmem:[%s274_s21] sm:$0x3] %vm847_vm2, %v843_v14 }
 0x2f5   : > { %1162 = shalt.err (!%p1159_p3)
}
 0x2f6   : > { %1092 = dma.vmem_to_hbm [thread:$0]  (%p1281_p5), %s864_s23, 32, %s866_s24, %s851_s6   ;;  %v837_v15 = vpop.f32.mrf.mxu3 }
 0x2f7 PF: > { %p1098_p4 = scmp.ge.s32.totalorder %s1197_s29, 2  ;;  %s877_s15 = sand.u32 1, %s1185_s26  }
 0x2f8   : > { %s878_s17 = scalar_lea.sflag [#allocation4], %s877_s15 }
 0x2f9   : > { %p1095_p7 = pnand %p1098_p4, %p1285_p6 }
 0x2fb   : > { %p1096_p8 = pneg %p1095_p7 }
 0x2fd   : > { %1180 = dma.done.wait (%p1096_p8), %s878_s17, 32  }
 0x2fe   : > { %1182 = vsyncadd (%p1096_p8), %s878_s17, 4294967264  ;;  %p19_p9 = scmp.ge.s32.totalorder %s1268_s8, 6   ;;  %s1487_s26 = smov %s1189_s27 }
 0x2ff   : > { %s1488_s27 = smov %s1193_s28  ;;  %s1489_s28 = smov %s1279_s11 }
 0x300   : > { %s1490_s29 = smov %s1268_s8  ;;  %21 = sbr.rel (!%p19_p9) target bundleno = 6 (0x6), region = 83 }
 0x305   :  { %884 = vsyncpa [#allocation4], 1 }
 0x306   :  { %886 = vsyncpa [#allocation4 + $0x1], 1 }

</bundles_post_ra>
